<compile_context>
chip_gen: v7x
topology: tpu7x:2x2x1
jax: 0.10.0
libtpu: 0.0.40
codegen_flags: <defaults>
</compile_context>

<pallas_src>
import jax
import jax.numpy as jnp
import numpy as np
from jax.experimental import pallas as pl
from jax.experimental.pallas import tpu as pltpu

increase_state_size = 1
HIGHEST = jax.lax.Precision.HIGHEST


# ----------------------------------------------------------------------------
# Fused Pallas kernel: folded SSM1 + act + folded SSM2 (last window) + head
# ----------------------------------------------------------------------------
def _ssmnet_kernel(u_ref, g1_ref, m2_ref, wb_ref, o_ref):
    """Whole SSMNet forward in one kernel (weights pre-folded at param prep).

    u_ref  : [B, L]           lane-dense input
    g1_ref : [L, Lout1*D1]    u -> pooled layer-1 pre-activation (SSM1+pool+C/D)
    m2_ref : [Lout1*D1, D2]   act(x1) -> last pooled layer-2 pre-activation
    wb_ref : [D2+1, 10]       head weight (rows 0:D2) and bias (last row)
    o_ref  : [B, 10]
    """
    # Layer 1 (SSM1 + mean-pool-4 + C/D projection): all 16 pooled time steps
    # produced by a single MXU matmul; x1 columns are laid out as p*D1 + d.
    x1 = jnp.dot(u_ref[...], g1_ref[...], preferred_element_type=jnp.float32)
    x1 = x1 * jax.lax.rsqrt(1.0 + x1 * x1)                 # fused activation (EUP)

    # Layer 2 (SSM2 + mean-pool-4 + C/D projection + last-step select), folded
    # into one matmul.  No recurrence, no carry chain.
    y = jnp.dot(x1, m2_ref[...], preferred_element_type=jnp.float32)
    y = y * jax.lax.rsqrt(1.0 + y * y)

    # Linear head: weight and bias come packed in one slab (one fewer DMA).
    wb = wb_ref[...]
    d2 = wb.shape[0] - 1
    head_w = wb[0:d2, :]
    head_b = wb[d2:d2 + 1, :]
    o_ref[...] = (jnp.dot(y, head_w, preferred_element_type=jnp.float32)
                  + head_b).astype(o_ref.dtype)


# ----------------------------------------------------------------------------
# Param folding (done once, outside the kernel; parameters only — never data)
# ----------------------------------------------------------------------------
def _fold_ssm1(a, b, c, d, seq_len, pool):
    """Fold SSM1 + mean-pool + C/D projection into G1[tau, p*D1 + dout]."""
    n = a.shape[1]
    dout = c.shape[1]
    lout = seq_len // pool
    t = jnp.arange(seq_len)
    expo = t[:, None] - t[None, :]                                   # t - tau
    mask = (expo >= 0).astype(jnp.float32)
    powa = a[0][None, None, :] ** jnp.maximum(expo, 0)[:, :, None]   # [L,L,N]
    hk = powa * mask[:, :, None] * b[0][None, None, :]               # dh_t/du_tau
    hkw = hk.reshape(lout, pool, seq_len, n).mean(axis=1)            # pooled h
    gh = jnp.einsum('ptn,nd->tpd', hkw, c, precision=HIGHEST)        # [L,Lout,D1]
    in_win = (t[:, None] // pool == jnp.arange(lout)[None, :]).astype(jnp.float32)
    gd = in_win[:, :, None] * d[0][None, None, :] / pool             # ubar*d term
    return (gh + gd).reshape(seq_len, lout * dout)


def _fold_ssm2(a, b, c, d, seq_len, pool):
    """Fold SSM2 + mean-pool + LAST-window select into M2[q*Din + din, dout]."""
    din = b.shape[0]
    dout = c.shape[1]
    q = jnp.arange(seq_len)
    p_last = jnp.arange(seq_len - pool, seq_len)                     # last window
    expo = p_last[:, None] - q[None, :]
    mask = (expo >= 0).astype(jnp.float32)
    powa = a[0][None, None, :] ** jnp.maximum(expo, 0)[:, :, None]   # [pool,L,N]
    wq = (powa * mask[:, :, None]).sum(axis=0) / pool                # [L,N]
    mh = jnp.einsum('qn,dn,no->qdo', wq, b, c, precision=HIGHEST)    # [L,Din,Dout]
    in_last = (q >= seq_len - pool).astype(jnp.float32)
    md = in_last[:, None, None] * d[None, :, :] / pool               # ubar@d term
    return (mh + md).reshape(seq_len * din, dout)


def prepare_kernel_params(params, *, seq_len=64, pool=4):
    """One-time param prep: fold SSM weights, pack head weight+bias."""
    (a1, b1, c1, d1), (a2, b2, c2, d2), (w, bias) = params
    lout1 = seq_len // pool
    assert seq_len % (pool * pool) == 0 and seq_len >= pool * pool
    g1 = _fold_ssm1(a1, b1, c1, d1, seq_len, pool)                   # [L, Lout1*D1]
    m2 = _fold_ssm2(a2, b2, c2, d2, lout1, pool)                     # [Lout1*D1, D2]
    wb = jnp.concatenate([jnp.transpose(w), bias.reshape(1, -1)], axis=0)
    return (g1.astype(jnp.float32), m2.astype(jnp.float32), wb.astype(jnp.float32))


# ----------------------------------------------------------------------------
# Wrapper
# ----------------------------------------------------------------------------
def _full_spec(shape):
    return pl.BlockSpec(shape, lambda *_: (0,) * len(shape))


@jax.jit
def ssmnet_forward(u, kparams):
    g1, m2, wb = kparams
    B, L, Din = u.shape
    assert Din == 1
    assert g1.shape[0] == L, "kernel params were folded for a different L"
    n_cls = wb.shape[1]

    u2 = u.reshape(B, L).astype(jnp.float32)          # lane-dense [B, L]

    return pl.pallas_call(
        _ssmnet_kernel,
        grid=(1,),
        in_specs=[_full_spec(u2.shape), _full_spec(g1.shape),
                  _full_spec(m2.shape), _full_spec(wb.shape)],
        out_specs=_full_spec((B, n_cls)),
        out_shape=jax.ShapeDtypeStruct((B, n_cls), jnp.float32),
        compiler_params=pltpu.CompilerParams(
            dimension_semantics=("arbitrary",)),
    )(u2, g1, m2, wb)


# ----------------------------------------------------------------------------
# Deterministic parameter init (torch-style layout for the reference)
# ----------------------------------------------------------------------------
def init_ssm_params(key, din, n, dout):
    k1, k2, k3, k4 = jax.random.split(key, 4)
    a = jax.nn.sigmoid(jax.random.normal(k1, (1, n), jnp.float32))   # (0,1) stable
    b = jax.random.normal(k2, (din, n), jnp.float32) / np.sqrt(din)
    c = jax.random.normal(k3, (n, dout), jnp.float32) / np.sqrt(n)
    d = jax.random.normal(k4, (din, dout), jnp.float32) / np.sqrt(din)
    return a, b, c, d


def init_params(key):
    k1, k2, k3, k4 = jax.random.split(key, 4)
    p1 = init_ssm_params(k1, 1, increase_state_size * 16, 16)
    p2 = init_ssm_params(k2, 16, increase_state_size * 128, 128)
    bound = 1.0 / np.sqrt(128.0)
    w = jax.random.uniform(k3, (10, 128), jnp.float32, -bound, bound)   # torch Linear
    bias = jax.random.uniform(k4, (10,), jnp.float32, -bound, bound)
    return p1, p2, (w, bias)


# ----------------------------------------------------------------------------
# Pure-JAX reference (step-by-step recurrence, for correctness check)
# ----------------------------------------------------------------------------
def ssm_ref(u, a, b, c, d, pool, apply_act):
    B, L, Din = u.shape
    h0 = jnp.zeros((B, a.shape[1]), jnp.float32)

    def step(h, u_t):
        h = a[0] * h + u_t @ b
        y = h @ c + u_t @ d
        return h, y

    _, ys = jax.lax.scan(step, h0, jnp.swapaxes(u, 0, 1))
    ys = jnp.swapaxes(ys, 0, 1)
    ys = ys.reshape(B, L // pool, pool, -1).mean(axis=2)
    if apply_act:
        ys = ys * jax.lax.rsqrt(1.0 + ys * ys)
    return ys


def ssmnet_ref(u, params):
    p1, p2, (w, bias) = params
    x = ssm_ref(u, *p1, pool=4, apply_act=True)
    x = ssm_ref(x, *p2, pool=4, apply_act=False)
    x = x[:, -1]
    x = x * jax.lax.rsqrt(1.0 + x * x)
    return x @ w.T + bias


# ----------------------------------------------------------------------------
if __name__ == "__main__":
    key = jax.random.PRNGKey(0)
    k_u, k_p = jax.random.split(key)

    B, L = 2, 64                      # 64 -> /4 -> 16 -> /4 -> 4 time steps
    u = jax.random.normal(k_u, (B, L, 1), jnp.float32)   # [batch, time, channels]
    params = init_params(k_p)
    kparams = prepare_kernel_params(params, seq_len=L, pool=4)   # one-time folding

    out = jax.block_until_ready(ssmnet_forward(u, kparams))
    ref = jax.block_until_ready(ssmnet_ref(u, params))

    assert out.shape == (B, 10), out.shape
    # Folded weights change the summation order vs. the step-by-step reference,
    # so allow slightly looser (still f32-tight) tolerances.
    np.testing.assert_allclose(np.asarray(out), np.asarray(ref), rtol=1e-3, atol=1e-3)
    print("KERNEL_OK")
</pallas_src>

<mosaic_0001>
module attributes {stable_mosaic.version = 11 : i64} {
  func.func @_ssmnet_kernel(%arg0: i32, %arg1: memref<2x64xf32, #tpu.memory_space<vmem>>, %arg2: memref<64x256xf32, #tpu.memory_space<vmem>>, %arg3: memref<256x128xf32, #tpu.memory_space<vmem>>, %arg4: memref<129x10xf32, #tpu.memory_space<vmem>>, %arg5: memref<2x10xf32, #tpu.memory_space<vmem>>) attributes {dimension_semantics = [#tpu.dimension_semantics<arbitrary>], iteration_bounds = array<i64: 1>, scalar_prefetch = 0 : i64, scratch_operands = 0 : i64, tpu.core_type = #tpu.core_type<tc>, window_params = [{pipeline_mode = #tpu.pipeline_mode<synchronous>, transform_indices = @transform_0, window_bounds = array<i64: 2, 64>}, {pipeline_mode = #tpu.pipeline_mode<synchronous>, transform_indices = @transform_1, window_bounds = array<i64: 64, 256>}, {pipeline_mode = #tpu.pipeline_mode<synchronous>, transform_indices = @transform_2, window_bounds = array<i64: 256, 128>}, {pipeline_mode = #tpu.pipeline_mode<synchronous>, transform_indices = @transform_3, window_bounds = array<i64: 129, 10>}, {pipeline_mode = #tpu.pipeline_mode<synchronous>, transform_indices = @transform_4, window_bounds = array<i64: 2, 10>}]} {
    %c0 = arith.constant 0 : index
    %c0_0 = arith.constant 0 : index
    %0 = vector.load %arg1[%c0, %c0_0] : memref<2x64xf32, #tpu.memory_space<vmem>>, vector<2x64xf32>
    %c0_1 = arith.constant 0 : index
    %c0_2 = arith.constant 0 : index
    %1 = vector.load %arg2[%c0_1, %c0_2] : memref<64x256xf32, #tpu.memory_space<vmem>>, vector<64x256xf32>
    %cst = arith.constant dense<0.000000e+00> : vector<2x256xf32>
    %2 = tpu.matmul %0, %1, %cst {dimension_numbers = #tpu.dot_dimension_numbers<[1], [0], [0], [1], [0, 0, 1, 1], [], []>} : vector<2x64xf32>, vector<64x256xf32>, vector<2x256xf32> -> vector<2x256xf32>
    %3 = arith.mulf %2, %2 : vector<2x256xf32>
    %cst_3 = arith.constant 1.000000e+00 : f32
    %4 = vector.broadcast %cst_3 : f32 to vector<2x256xf32>
    %5 = arith.addf %4, %3 : vector<2x256xf32>
    %6 = math.rsqrt %5 : vector<2x256xf32>
    %7 = arith.mulf %2, %6 : vector<2x256xf32>
    %c0_4 = arith.constant 0 : index
    %c0_5 = arith.constant 0 : index
    %8 = vector.load %arg3[%c0_4, %c0_5] : memref<256x128xf32, #tpu.memory_space<vmem>>, vector<256x128xf32>
    %cst_6 = arith.constant dense<0.000000e+00> : vector<2x128xf32>
    %9 = tpu.matmul %7, %8, %cst_6 {dimension_numbers = #tpu.dot_dimension_numbers<[1], [0], [0], [1], [0, 0, 1, 1], [], []>} : vector<2x256xf32>, vector<256x128xf32>, vector<2x128xf32> -> vector<2x128xf32>
    %10 = arith.mulf %9, %9 : vector<2x128xf32>
    %cst_7 = arith.constant 1.000000e+00 : f32
    %11 = vector.broadcast %cst_7 : f32 to vector<2x128xf32>
    %12 = arith.addf %11, %10 : vector<2x128xf32>
    %13 = math.rsqrt %12 : vector<2x128xf32>
    %14 = arith.mulf %9, %13 : vector<2x128xf32>
    %c0_8 = arith.constant 0 : index
    %c0_9 = arith.constant 0 : index
    %15 = vector.load %arg4[%c0_8, %c0_9] : memref<129x10xf32, #tpu.memory_space<vmem>>, vector<129x10xf32>
    %16 = vector.extract_strided_slice %15 {offsets = [0, 0], sizes = [128, 10], strides = [1, 1]} : vector<129x10xf32> to vector<128x10xf32>
    %17 = vector.extract_strided_slice %15 {offsets = [128, 0], sizes = [1, 10], strides = [1, 1]} : vector<129x10xf32> to vector<1x10xf32>
    %cst_10 = arith.constant dense<0.000000e+00> : vector<2x10xf32>
    %18 = tpu.matmul %14, %16, %cst_10 {dimension_numbers = #tpu.dot_dimension_numbers<[1], [0], [0], [1], [0, 0, 1, 1], [], []>} : vector<2x128xf32>, vector<128x10xf32>, vector<2x10xf32> -> vector<2x10xf32>
    %19 = vector.broadcast %17 : vector<1x10xf32> to vector<2x10xf32>
    %20 = arith.addf %18, %19 : vector<2x10xf32>
    %c0_11 = arith.constant 0 : index
    %c0_12 = arith.constant 0 : index
    %21 = vector.load %arg5[%c0_11, %c0_12] : memref<2x10xf32, #tpu.memory_space<vmem>>, vector<2x10xf32>
    tpu.vector_store %arg5[%c0_11, %c0_12], %20 {strides = array<i32>} : memref<2x10xf32, #tpu.memory_space<vmem>>, vector<2x10xf32>,
    return
  }
  func.func @transform_0(%arg0: i32) -> (i32, i32) {
    %c0_i32 = arith.constant 0 : i32
    %c0_i32_0 = arith.constant 0 : i32
    %c0_i32_1 = arith.constant 0 : i32
    return %c0_i32, %c0_i32_0 : i32, i32
  }
  func.func @transform_1(%arg0: i32) -> (i32, i32) {
    %c0_i32 = arith.constant 0 : i32
    %c0_i32_0 = arith.constant 0 : i32
    %c0_i32_1 = arith.constant 0 : i32
    return %c0_i32, %c0_i32_0 : i32, i32
  }
  func.func @transform_2(%arg0: i32) -> (i32, i32) {
    %c0_i32 = arith.constant 0 : i32
    %c0_i32_0 = arith.constant 0 : i32
    %c0_i32_1 = arith.constant 0 : i32
    return %c0_i32, %c0_i32_0 : i32, i32
  }
  func.func @transform_3(%arg0: i32) -> (i32, i32) {
    %c0_i32 = arith.constant 0 : i32
    %c0_i32_0 = arith.constant 0 : i32
    %c0_i32_1 = arith.constant 0 : i32
    return %c0_i32, %c0_i32_0 : i32, i32
  }
  func.func @transform_4(%arg0: i32) -> (i32, i32) {
    %c0_i32 = arith.constant 0 : i32
    %c0_i32_0 = arith.constant 0 : i32
    %c0_i32_1 = arith.constant 0 : i32
    return %c0_i32, %c0_i32_0 : i32, i32
  }
}

</mosaic_0001>

<bundles_post_ra>
// kernel: ssmnet_forward.1
= control target key start
LH: loop header
LB: loop body
LE: loop exit
PB: predicated region body
PF: predicated region fallthrough
CT: control target
= control target key end

     0   :  { %9 = vsyncpa [#allocation3], 0  ;;  %s728_s0 = inlined_call_operand.vmem [shape: f32[2,64], index: 0, kind: input, shape index: {}]   ;;  %s729_s1 = inlined_call_operand.vmem [shape: f32[64,256], index: 1, kind: input, shape index: {}]   ;;  %s730_s2 = inlined_call_operand.hbm [shape: f32[256,128], index: 2, kind: input, shape index: {}]   ;;  %s731_s3 = inlined_call_operand.vmem [shape: f32[129,10], index: 3, kind: input, shape index: {}]   ;;  %s732_s4 = inlined_call_operand.hbm [shape: f32[2,10], index: 4, kind: output, shape index: {}]  }
   0x1   :  { %10 = vsyncpa [#allocation4], 0  ;;  %s568_s15 = smov [#allocation2]   ;;  %s520_s19 = scalar_lea.hbm %s730_s2, 4096 }
   0x2   :  { %s20_s16 = sshll.u32 %s568_s15, 4  ;;  %p521_p0 = scmp.ne.s32.totalorder %s730_s2, %s520_s19  ;;  %s21_s16 = int_to_ptr.vmem [resolvable:$true] %s20_s16 }
   0x3   :  { %p524_p1 = scmp.lt.u32.totalorder %s520_s19, %s730_s2 }
   0x5   :  { %p526_p2 = pnand %p524_p1, %p521_p0 }
   0x7   :  { %529 = shalt.err (!%p526_p2)
}
   0x8   :  { %s530_s24 = scalar_lea.vmem %s21_s16, 4096  ;;  %p535_p4 = scmp.lt.s32.totalorder %s21_s16, %s21_s16 }
   0x9   :  { %p531_p3 = scmp.ne.s32.totalorder %s21_s16, %s530_s24  ;;  %p536_p5 = scmp.lt.s32.totalorder %s530_s24, %s530_s24 }
   0xb   :  { %p537_p6 = por %p536_p5, %p535_p4 }
   0xd   :  { %p538_p7 = pnand %p537_p6, %p531_p3 }
   0xf   :  { %541 = shalt.err (!%p538_p7)
}
  0x10   :  { %s569_s25 = smov 128   ;;  %s570_s26 = smov 8  }
  0x11   :  { %26 = dma.hbm_to_vmem [thread:$0]  %s730_s2, 4096, %s21_s16, [#allocation3], %s569_s25, %s569_s25, %s570_s26  }
  0x12   :  { %564 = dma.done.wait [#allocation3], 4096  }
  0x13   :  { %565 = vsyncadd [#allocation3], 4294963200  ;;  %v571_v0 = vmov 0.0   ;;  %v34_v1 = vld [vmem:[%s729_s1 + $0x8] sm:$0xff]  ;;  %v36_v2 = vld [vmem:[%s729_s1 + $0x18] sm:$0xff]  ;;  %vm49_vm0 = vcmask 523264  }
  0x14   :  { %117 = vmatprep.mubr.f32.mxu0 %v571_v0  ;;  %v33_v3 = vld [vmem:[%s729_s1] sm:$0xff]  ;;  %v435_v4 = vpack.c.bf16 %v36_v2, %v34_v1  ;;  %v35_v5 = vld [vmem:[%s729_s1 + $0x10] sm:$0xff]  ;;  %v38_v6 = vld [vmem:[%s729_s1 + $0x28] sm:$0xff]  ;;  %vm573_vm1 = vmmov 0   ;;  %s574_s12 = smov [#allocation5]   ;;  %vm329_vm2 = vcmask 74752  }
  0x15   :  { %v40_v7 = vld [vmem:[%s729_s1 + $0x38] sm:$0xff]  ;;  %v437_v8 = vpack.c.bf16 %v35_v5, %v33_v3  ;;  %v37_v10 = vld [vmem:[%s729_s1 + $0x20] sm:$0xff]  ;;  %v39_v11 = vld [vmem:[%s729_s1 + $0x30] sm:$0xff]  ;;  %s337_s13 = sshll.u32 %s574_s12, 4  ;;  %s338_s13 = int_to_ptr.vmem [resolvable:$true] %s337_s13 }
  0x16   :  { %v439_v9 = vpack.c.bf16 %v40_v7, %v38_v6  ;;  %v42_v12 = vld [vmem:[%s729_s1 + $0x48] sm:$0xff]  ;;  %436 = vmatprep.subr.bf16.mxu0 %v435_v4  ;;  %v44_v13 = vld [vmem:[%s729_s1 + $0x58] sm:$0xff]  ;;  %v441_v14 = vpack.c.bf16 %v39_v11, %v37_v10  ;;  %v41_v15 = vld [vmem:[%s729_s1 + $0x40] sm:$0xff]  ;;  %s542_s14 = scalar_lea.vmem %s338_s13, 32  ;;  %p547_p9 = scmp.lt.s32.totalorder %s338_s13, %s338_s13 }
  0x17   :  { %438 = vmatpush1.bf16.msra.mxu0 %v437_v8  ;;  %v43_v16 = vld [vmem:[%s729_s1 + $0x50] sm:$0xff]  ;;  %v443_v17 = vpack.c.bf16 %v44_v13, %v42_v12  ;;  %v46_v18 = vld [vmem:[%s729_s1 + $0x68] sm:$0xff]  ;;  %v48_v19 = vld [vmem:[%s729_s1 + $0x78] sm:$0xff]  ;;  %p543_p8 = scmp.ne.s32.totalorder %s338_s13, %s542_s14  ;;  %p548_p10 = scmp.lt.s32.totalorder %s542_s14, %s542_s14 }
  0x18   :  { %440 = vmatprep.subr.bf16.mxu0 %v439_v9  ;;  %v148_v20 = vld [vmem:[#allocation2 + $0x80] sm:$0xff]  ;;  %v149_v21 = vld [vmem:[#allocation2 + $0x88] sm:$0xff]  ;;  %v150_v26 = vld [vmem:[#allocation2 + $0x90] sm:$0xff]  ;;  %v445_v29 = vpack.c.bf16 %v43_v16, %v41_v15  ;;  %v447_v34 = vpack.c.bf16 %v48_v19, %v46_v18 }
  0x19   :  { %v132_v22 = vld [vmem:[#allocation2] sm:$0xff]  ;;  %v133_v23 = vld [vmem:[#allocation2 + $0x8] sm:$0xff]  ;;  %v451_v24 = vpack.c.bf16 %v149_v21, %v148_v20  ;;  %v151_v27 = vld [vmem:[#allocation2 + $0x98] sm:$0xff]  ;;  %p549_p11 = por %p548_p10, %p547_p9 }
  0x1a   :  { %v453_v25 = vpack.c.bf16 %v133_v23, %v132_v22  ;;  %v134_v28 = vld [vmem:[#allocation2 + $0x10] sm:$0xff]  ;;  %v455_v30 = vpack.c.bf16 %v151_v27, %v150_v26  ;;  %v135_v31 = vld [vmem:[#allocation2 + $0x18] sm:$0xff]  ;;  %v152_v32 = vld [vmem:[#allocation2 + $0xa0] sm:$0xff] }
  0x1b   :  { %442 = vmatpush1.bf16.msra.mxu0 %v441_v14  ;;  %v153_v33 = vld [vmem:[#allocation2 + $0xa8] sm:$0xff]  ;;  %v45_v35 = vld [vmem:[%s729_s1 + $0x60] sm:$0xff]  ;;  %v47_v36 = vld [vmem:[%s729_s1 + $0x70] sm:$0xff]  ;;  %452 = vmatprep.subr.bf16.mxu1 %v451_v24  ;;  %v457_v37 = vpack.c.bf16 %v135_v31, %v134_v28  ;;  %v572_v14 = vmov 0.0|0.0   ;;  %p550_p12 = pnand %p549_p11, %p543_p8 }
  0x1c   :  { %444 = vmatprep.subr.bf16.mxu0 %v443_v17  ;;  %454 = vmatpush3.bf16.msra.mxu1 %v453_v25  ;;  %v459_v38 = vpack.c.bf16 %v153_v33, %v152_v32  ;;  %v136_v39 = vld [vmem:[#allocation2 + $0x20] sm:$0xff]  ;;  %v137_v40 = vld [vmem:[#allocation2 + $0x28] sm:$0xff]  ;;  %v449_v41 = vpack.c.bf16 %v47_v36, %v45_v35  ;;  %v154_v44 = vld [vmem:[#allocation2 + $0xb0] sm:$0xff] }
  0x1d   :  { %456 = vmatprep.subr.bf16.mxu1 %v455_v30  ;;  %v461_v42 = vpack.c.bf16 %v137_v40, %v136_v39  ;;  %v32_v43 = vld [vmem:[%s728_s0] sm:$0x3]  ;;  %v155_v45 = vld [vmem:[#allocation2 + $0xb8] sm:$0xff]  ;;  %v138_v47 = vld [vmem:[#allocation2 + $0x30] sm:$0xff] }
  0x1e   :  { %v463_v46 = vpack.c.bf16 %v155_v45, %v154_v44  ;;  %v139_v48 = vld [vmem:[#allocation2 + $0x38] sm:$0xff]  ;;  %v156_v50 = vld [vmem:[#allocation2 + $0xc0] sm:$0xff]  ;;  %v157_v51 = vld [vmem:[#allocation2 + $0xc8] sm:$0xff] }
  0x1f   :  { %446 = vmatpush1.bf16.msra.mxu0 %v445_v29  ;;  %v465_v49 = vpack.c.bf16 %v139_v48, %v138_v47  ;;  %v467_v52 = vpack.c.bf16 %v157_v51, %v156_v50  ;;  %v140_v53 = vld [vmem:[#allocation2 + $0x40] sm:$0xff]  ;;  %v141_v54 = vld [vmem:[#allocation2 + $0x48] sm:$0xff]  ;;  %v158_v56 = vld [vmem:[#allocation2 + $0xd0] sm:$0xff] }
  0x20   :  { %448 = vmatprep.subr.bf16.mxu0 %v447_v34  ;;  %458 = vmatpush3.bf16.msra.mxu1 %v457_v37  ;;  %v469_v55 = vpack.c.bf16 %v141_v54, %v140_v53  ;;  %v159_v57 = vld [vmem:[#allocation2 + $0xd8] sm:$0xff]  ;;  %v142_v59 = vld [vmem:[#allocation2 + $0x50] sm:$0xff]  ;;  %v160_v62 = vld [vmem:[#allocation2 + $0xe0] sm:$0xff] }
  0x21   :  { %460 = vmatprep.subr.bf16.mxu1 %v459_v38  ;;  %v471_v58 = vpack.c.bf16 %v159_v57, %v158_v56  ;;  %v143_v60 = vld [vmem:[#allocation2 + $0x58] sm:$0xff]  ;;  %v161_v63 = vld [vmem:[#allocation2 + $0xe8] sm:$0xff]  ;;  %v144_v2 = vld [vmem:[#allocation2 + $0x60] sm:$0xff] }
  0x22   :  { %v473_v61 = vpack.c.bf16 %v143_v60, %v142_v59  ;;  %v475_v1 = vpack.c.bf16 %v161_v63, %v160_v62  ;;  %v145_v3 = vld [vmem:[#allocation2 + $0x68] sm:$0xff]  ;;  %v162_v5 = vld [vmem:[#allocation2 + $0xf0] sm:$0xff]  ;;  %v163_v6 = vld [vmem:[#allocation2 + $0xf8] sm:$0xff] }
  0x23   :  { %450 = vmatpush1.bf16.msra.mxu0 %v449_v41  ;;  %v477_v4 = vpack.c.bf16 %v145_v3, %v144_v2  ;;  %v479_v7 = vpack.c.bf16 %v163_v6, %v162_v5  ;;  %v146_v8 = vld [vmem:[#allocation2 + $0x70] sm:$0xff]  ;;  %v147_v9 = vld [vmem:[#allocation2 + $0x78] sm:$0xff]  ;;  %v238_v11 = vld [vmem:[%s731_s3] sm:$0xff] }
  0x24   :  { %462 = vmatpush3.bf16.msra.mxu1 %v461_v42  ;;  %v481_v10 = vpack.c.bf16 %v147_v9, %v146_v8  ;;  %v239_v12 = vld [vmem:[%s731_s3 + $0x8] sm:$0xff]  ;;  %v240_v13 = vld [vmem:[%s731_s3 + $0x10] sm:$0xff]  ;;  %483 = vmatprep.subr.bf16.mxu0 %v572_v14  ;;  %v241_v16 = vld [vmem:[%s731_s3 + $0x18] sm:$0xff] }
  0x25   :  { %464 = vmatprep.subr.bf16.mxu1 %v463_v46  ;;  %v484_v15 = vpack.c.bf16 %v239_v12, %v238_v11  ;;  %v487_v17 = vpack.c.bf16 %v241_v16, %v240_v13  ;;  %v242_v18 = vld [vmem:[%s731_s3 + $0x20] sm:$0xff]  ;;  %v243_v19 = vld [vmem:[%s731_s3 + $0x28] sm:$0xff]  ;;  %v244_v31 = vld [vmem:[%s731_s3 + $0x30] sm:$0xff] }
  0x26   :  { %346 = vmatmul.mubr.msk.f32.vlgmr.msra.gmra.mrb[0].mxu0 %vm49_vm0, %v32_v43  ;;  %v490_v20 = vpack.c.bf16 %v243_v19, %v242_v18  ;;  %v245_v32 = vld [vmem:[%s731_s3 + $0x38] sm:$0xff]  ;;  %v246_v34 = vld [vmem:[%s731_s3 + $0x40] sm:$0xff]  ;;  %v247_v35 = vld [vmem:[%s731_s3 + $0x48] sm:$0xff] }
  0x27   :  { %485 = vmatpush3.bf16.msra.mxu0 %v484_v15  ;;  %v493_v33 = vpack.c.bf16 %v245_v32, %v244_v31  ;;  %v496_v36 = vpack.c.bf16 %v247_v35, %v246_v34  ;;  %v248_v37 = vld [vmem:[%s731_s3 + $0x50] sm:$0xff]  ;;  %v249_v38 = vld [vmem:[%s731_s3 + $0x58] sm:$0xff]  ;;  %v250_v40 = vld [vmem:[%s731_s3 + $0x60] sm:$0xff]  ;;  %432 = vmatprep.mubr.msk.f32.mxu0 %vm573_vm1, %v571_v0 }
  0x28   :  { %466 = vmatpush3.bf16.msra.mxu1 %v465_v49  ;;  %486 = vmatprep.subr.bf16.mxu0 %v572_v14  ;;  %v499_v39 = vpack.c.bf16 %v249_v38, %v248_v37  ;;  %v251_v41 = vld [vmem:[%s731_s3 + $0x68] sm:$0xff]  ;;  %v252_v43 = vld [vmem:[%s731_s3 + $0x70] sm:$0xff]  ;;  %v253_v44 = vld [vmem:[%s731_s3 + $0x78] sm:$0xff] }
  0x29   :  { %468 = vmatprep.subr.bf16.mxu1 %v467_v52  ;;  %v502_v42 = vpack.c.bf16 %v251_v41, %v250_v40  ;;  %v505_v45 = vpack.c.bf16 %v253_v44, %v252_v43  ;;  %v347_v53 = vld [vmem:[%s731_s3 + $0x80] ss:$0 sm:$0xff] }
  0x2b   :  { %488 = vmatpush3.bf16.msra.mxu0 %v487_v17 }
  0x2c   :  { %470 = vmatpush3.bf16.msra.mxu1 %v469_v55  ;;  %489 = vmatprep.subr.bf16.mxu0 %v572_v14 }
  0x2d   :  { %472 = vmatprep.subr.bf16.mxu1 %v471_v58 }
  0x2f   :  { %491 = vmatpush3.bf16.msra.mxu0 %v490_v20 }
  0x30   :  { %474 = vmatpush3.bf16.msra.mxu1 %v473_v61  ;;  %492 = vmatprep.subr.bf16.mxu0 %v572_v14 }
  0x31   :  { %476 = vmatprep.subr.bf16.mxu1 %v475_v1 }
  0x33   :  { %494 = vmatpush3.bf16.msra.mxu0 %v493_v33 }
  0x34   :  { %478 = vmatpush3.bf16.msra.mxu1 %v477_v4  ;;  %495 = vmatprep.subr.bf16.mxu0 %v572_v14 }
  0x35   :  { %480 = vmatprep.subr.bf16.mxu1 %v479_v7 }
  0x37   :  { %497 = vmatpush3.bf16.msra.mxu0 %v496_v36 }
  0x38   :  { %482 = vmatpush3.bf16.msra.mxu1 %v481_v10  ;;  %498 = vmatprep.subr.bf16.mxu0 %v572_v14 }
  0x3b   :  { %500 = vmatpush3.bf16.msra.mxu0 %v499_v39 }
  0x3c   :  { %501 = vmatprep.subr.bf16.mxu0 %v572_v14 }
  0x3f   :  { %503 = vmatpush3.bf16.msra.mxu0 %v502_v42 }
  0x40   :  { %504 = vmatprep.subr.bf16.mxu0 %v572_v14 }
  0x43   :  { %506 = vmatpush3.bf16.msra.mxu0 %v505_v45 }
  0xf9   :  { %v119_v21 = vpop.f32.mrb[0].mxu0 }
  0xfa   :  { %v124_v22 = vmul.f32 %v119_v21, %v119_v21  ;;  %v121_v23 = vpop.f32.mrb[1].mxu0 }
  0xfb   :  { %v125_v24 = vmul.f32 %v121_v23, %v121_v23 }
  0xfc   :  { %v126_v25 = vadd.f32 1.0, %v124_v22 }
  0xfd   :  { %v127_v26 = vadd.f32 1.0, %v125_v24 }
  0xfe   :  { %514 = vrsqrt.f32 %v126_v25 }
  0xff   :  { %516 = vrsqrt.f32 %v127_v26 }
 0x108   :  { %v515_v27 = vpop.eup %514 }
 0x109   :  { %v517_v28 = vpop.eup %516  ;;  %v130_v30 = vmul.f32 %v515_v27, %v119_v21 }
 0x10a   :  { %v131_v29 = vmul.f32 %v517_v28, %v121_v23 }
 0x10c   :  { %228 = vmatprep.mubr.f32.mxu1 %v131_v29 }
 0x10d   :  { %229 = vmatmul.mubr.f32.vlgmr.msra.gmra.mrb[0].mxu1 %v130_v30 }
 0x1e0   :  { %v380_v46 = vpop.f32.mrb[0].mxu1 }
 0x1e1   :  { %v381_v47 = vpop.f32.mrb[1].mxu1 }
 0x1e2   :  { %v382_v48 = vadd.f32 %v381_v47, %v380_v46 }
 0x1e4   :  { %v234_v49 = vmul.f32 %v382_v48, %v382_v48 }
 0x1e6   :  { %v235_v50 = vadd.f32 1.0, %v234_v49 }
 0x1e8   :  { %518 = vrsqrt.f32 %v235_v50 }
 0x1f2   :  { %v519_v51 = vpop.eup %518 }
 0x1f3   :  { %v237_v52 = vmul.f32 %v519_v51, %v382_v48 }
 0x1f5   :  { %433 = vmatmul.mubr.f32.vlgmr.msra.gmra.mrb[2].mxu0 %v237_v52 }
 0x2c8   :  { %v325_v54 = vpop.f32.mrb[2].mxu0 }
 0x2c9   :  { %v326_v55 = vadd.f32 %v347_v53, %v325_v54  ;;  %v434_v56 = vpop.f32.mrb[3].mxu0 }
 0x2cb   :  { %330 = vst.msk [vmem:[#allocation5] sm:$0x3] %vm329_vm2, %v326_v55 }
 0x2cc   :  { %553 = shalt.err (!%p550_p12)
}
 0x2cd   :  { %s554_s17 = scalar_lea.hbm %s732_s4, 32 }
 0x2ce   :  { %p555_p13 = scmp.ne.s32.totalorder %s732_s4, %s554_s17  ;;  %p558_p0 = scmp.lt.u32.totalorder %s554_s17, %s732_s4 }
 0x2d0   :  { %p560_p1 = pnand %p558_p0, %p555_p13 }
 0x2d2   :  { %563 = shalt.err (!%p560_p1)
}
 0x2d3   :  { %340 = dma.vmem_to_hbm [thread:$0]  %s338_s13, 32, %s732_s4, [#allocation4]  }
 0x2d4   :  { %566 = dma.done.wait [#allocation4], 32  }
 0x2d5   :  { %567 = vsyncadd [#allocation4], 4294967264 }
 0x2d6   :  { %344 = vsyncpa [#allocation3], 1 }
 0x2d7   :  { %345 = vsyncpa [#allocation4], 1 }

</bundles_post_ra>
